<compile_context>
chip_gen: v7x
topology: tpu7x:2x2x1
jax: 0.10.0
libtpu: 0.0.40
codegen_flags: <defaults>
</compile_context>

<pallas_src>
import math

import jax
import jax.numpy as jnp
from jax.experimental import pallas as pl
from jax.experimental.pallas import tpu as pltpu


def _round_up(x, m):
    return (x + m - 1) // m * m


def _make_kernel(smoothing_value, confidence, ignore_index, tb, tv, v_total,
                 need_col_mask):
    sv = float(smoothing_value)
    conf = float(confidence)
    # p * log(p) for the two possible nonzero values of p, as compile-time consts.
    sv_log_sv = sv * math.log(sv)
    conf_log_conf = conf * math.log(conf) if conf > 0.0 else 0.0
    ignore_index = int(ignore_index)
    v_total = int(v_total)

    def kernel(target_ref, output_ref, out_ref, acc_ref):
        j = pl.program_id(1)

        @pl.when(j == 0)
        def _():
            acc_ref[...] = jnp.zeros_like(acc_ref)

        tgt = target_ref[...]                                # (tb, 1) int32
        logp = output_ref[...].astype(jnp.float32)           # (tb, tv)
        col0 = j * tv                                        # traced scalar
        cols = jax.lax.broadcasted_iota(jnp.int32, (tb, tv), 1)

        # Compare against shifted targets (scalar/(tb,1) adds, not a (tb,tv) add).
        is_tgt = cols == (tgt - col0)
        coef = jnp.where(is_tgt, jnp.float32(conf), jnp.float32(sv))
        const = jnp.where(is_tgt, jnp.float32(conf_log_conf), jnp.float32(sv_log_sv))
        # kl_div pointwise term p*(log p - logp) with p*log p folded to constants.
        term = const - coef * logp

        # Zero where model_prob == 0: ignore_index column, rows whose target is
        # ignore_index, and (only if the vocab was padded) out-of-range columns.
        zero = (cols == (ignore_index - col0)) | (tgt == ignore_index)
        if need_col_mask:
            zero = zero | (cols >= (v_total - col0))
        term = jnp.where(zero, 0.0, term)

        acc_ref[...] += term

        @pl.when(j == pl.num_programs(1) - 1)
        def _():
            total = jnp.sum(acc_ref[...])
            r = jax.lax.broadcasted_iota(jnp.int32, (1, 8, 128), 1)
            c = jax.lax.broadcasted_iota(jnp.int32, (1, 8, 128), 2)
            out_ref[...] = jnp.where((r == 0) & (c == 0), total, 0.0)

    return kernel


def label_smoothed_cross_entropy(output, target, *, tgt_vocab_size,
                                 label_smoothing, ignore_index):
    """output: (B, V) log-probs (f32 or bf16).  target: (B,) int.  Returns scalar f32."""
    assert 0.0 < label_smoothing <= 1.0
    B, V = output.shape
    assert V == tgt_vocab_size

    smoothing_value = label_smoothing / (tgt_vocab_size - 2)
    confidence = 1.0 - label_smoothing

    # Tile selection: lane-dense vocab tiles (<= 2048 f32 cols -> <= 2 MiB/buffer,
    # double-buffered + accumulator stays well inside v7x's 64 MiB VMEM and v5e's
    # 16 MiB default scoped budget), batch tiled to <= 256 rows.
    tv = min(2048, _round_up(V, 128))
    v_pad = _round_up(V, tv)
    tb = min(256, _round_up(B, 8))
    b_pad = _round_up(B, tb)
    need_col_mask = v_pad != V

    target2d = target.astype(jnp.int32).reshape(B, 1)
    if b_pad != B:
        # Padded rows get ignore_index -> contribute exactly zero.
        target2d = jnp.pad(target2d, ((0, b_pad - B), (0, 0)),
                           constant_values=ignore_index)
    out_arr = output
    if (b_pad != B) or (v_pad != V):
        out_arr = jnp.pad(output, ((0, b_pad - B), (0, v_pad - V)))

    nb, nv = b_pad // tb, v_pad // tv
    kernel = _make_kernel(smoothing_value, confidence, ignore_index,
                          tb, tv, V, need_col_mask)

    partials = pl.pallas_call(
        kernel,
        out_shape=jax.ShapeDtypeStruct((nb, 8, 128), jnp.float32),
        grid_spec=pltpu.PrefetchScalarGridSpec(
            num_scalar_prefetch=0,
            grid=(nb, nv),
            in_specs=[
                pl.BlockSpec((tb, 1), lambda i, j: (i, 0)),
                pl.BlockSpec((tb, tv), lambda i, j: (i, j)),
            ],
            out_specs=pl.BlockSpec((1, 8, 128), lambda i, j: (i, 0, 0)),
            scratch_shapes=[pltpu.VMEM((tb, tv), jnp.float32)],
        ),
        compiler_params=pltpu.CompilerParams(
            dimension_semantics=("parallel", "arbitrary")),
    )(target2d, out_arr)
    # Per-batch-block partials (one scalar per block, rest zeros) summed here.
    return jnp.sum(partials)


def _reference(output, target, tgt_vocab_size, label_smoothing, ignore_index):
    sv = label_smoothing / (tgt_vocab_size - 2)
    conf = 1.0 - label_smoothing
    cols = jnp.arange(tgt_vocab_size)[None, :]
    tgt = target.astype(jnp.int32)[:, None]
    p = jnp.full(output.shape, sv, jnp.float32)
    p = jnp.where(cols == ignore_index, 0.0, p)
    p = jnp.where(cols == tgt, conf, p)
    p = jnp.where(tgt == ignore_index, 0.0, p)
    safe_p = jnp.where(p > 0, p, 1.0)
    return jnp.sum(jnp.where(p > 0, p * (jnp.log(safe_p) - output), 0.0))


if __name__ == "__main__":
    B = 6                       # deliberately not a multiple of 8 (exercise row pad)
    V = 500                     # deliberately not a multiple of 128 (exercise col pad)
    label_smoothing = 0.1
    ignore_index = 1            # padding index inside vocab (one_hot[ignore_index]=0)

    key = jax.random.PRNGKey(0)
    k_logits, k_tgt = jax.random.split(key)

    logits = jax.random.normal(k_logits, (B, V), dtype=jnp.float32)
    output = jax.nn.log_softmax(logits, axis=-1)     # kl_div input = log-probs
    target = jax.random.randint(k_tgt, (B,), 0, V, dtype=jnp.int32)
    target = target.at[2].set(ignore_index)          # exercise the ignored-row path

    loss = label_smoothed_cross_entropy(
        output, target,
        tgt_vocab_size=V,
        label_smoothing=label_smoothing,
        ignore_index=ignore_index,
    )
    loss = jax.block_until_ready(loss)

    ref = _reference(output, target, V, label_smoothing, ignore_index)
    assert jnp.allclose(loss, ref, rtol=1e-5, atol=1e-5), (loss, ref)
    print("KERNEL_OK")
</pallas_src>

<mosaic_0001>
module attributes {stable_mosaic.version = 11 : i64} {
  func.func @kernel(%arg0: i32, %arg1: i32, %arg2: memref<8x1xi32, #tpu.memory_space<vmem>>, %arg3: memref<8x512xf32, #tpu.memory_space<vmem>>, %arg4: memref<1x8x128xf32, #tpu.memory_space<vmem>>, %arg5: memref<8x512xf32, #tpu.memory_space<vmem>>) attributes {dimension_semantics = [#tpu.dimension_semantics<parallel>, #tpu.dimension_semantics<arbitrary>], iteration_bounds = array<i64: 1, 1>, scalar_prefetch = 0 : i64, scratch_operands = 1 : i64, tpu.core_type = #tpu.core_type<tc>, window_params = [{transform_indices = @transform_0, window_bounds = array<i64: 8, 1>}, {transform_indices = @transform_1, window_bounds = array<i64: 8, 512>}, {transform_indices = @transform_2, window_bounds = array<i64: 1, 8, 128>}]} {
    %c0_i32 = arith.constant 0 : i32
    %0 = arith.cmpi eq, %arg1, %c0_i32 : i32
    %1 = arith.extui %0 : i1 to i32
    %c0_i32_0 = arith.constant 0 : i32
    %2 = arith.cmpi ne, %1, %c0_i32_0 : i32
    scf.if %2 {
      %cst_15 = arith.constant 0.000000e+00 : f32
      %38 = vector.broadcast %cst_15 : f32 to vector<8x512xf32>
      %c0_16 = arith.constant 0 : index
      %c0_17 = arith.constant 0 : index
      %39 = vector.load %arg5[%c0_16, %c0_17] : memref<8x512xf32, #tpu.memory_space<vmem>>, vector<8x512xf32>
      tpu.vector_store %arg5[%c0_16, %c0_17], %38 {strides = array<i32>} : memref<8x512xf32, #tpu.memory_space<vmem>>, vector<8x512xf32>,
    } else {
    }
    %c0 = arith.constant 0 : index
    %c0_1 = arith.constant 0 : index
    %3 = vector.load %arg2[%c0, %c0_1] : memref<8x1xi32, #tpu.memory_space<vmem>>, vector<8x1xi32>
    %c0_2 = arith.constant 0 : index
    %c0_3 = arith.constant 0 : index
    %4 = vector.load %arg3[%c0_2, %c0_3] : memref<8x512xf32, #tpu.memory_space<vmem>>, vector<8x512xf32>
    %c512_i32 = arith.constant 512 : i32
    %5 = arith.muli %arg1, %c512_i32 : i32
    %6 = tpu.iota {dimensions = array<i32: 1>} : vector<8x512xi32>
    %7 = vector.broadcast %5 : i32 to vector<8x1xi32>
    %8 = arith.subi %3, %7 : vector<8x1xi32>
    %9 = vector.broadcast %8 : vector<8x1xi32> to vector<8x512xi32>
    %10 = arith.cmpi eq, %6, %9 : vector<8x512xi32>
    %cst = arith.constant 0.899999976 : f32
    %cst_4 = arith.constant 2.00803217E-4 : f32
    %11 = vector.broadcast %cst : f32 to vector<8x512xf32>
    %12 = vector.broadcast %cst_4 : f32 to vector<8x512xf32>
    %13 = arith.select %10, %11, %12 : vector<8x512xi1>, vector<8x512xf32>
    %cst_5 = arith.constant -0.0948244631 : f32
    %cst_6 = arith.constant -0.00170947495 : f32
    %14 = vector.broadcast %cst_5 : f32 to vector<8x512xf32>
    %15 = vector.broadcast %cst_6 : f32 to vector<8x512xf32>
    %16 = arith.select %10, %14, %15 : vector<8x512xi1>, vector<8x512xf32>
    %17 = arith.mulf %13, %4 : vector<8x512xf32>
    %18 = arith.subf %16, %17 : vector<8x512xf32>
    %c1_i32 = arith.constant 1 : i32
    %19 = arith.subi %c1_i32, %5 : i32
    %20 = vector.broadcast %19 : i32 to vector<8x512xi32>
    %21 = arith.cmpi eq, %6, %20 : vector<8x512xi32>
    %c1_i32_7 = arith.constant 1 : i32
    %22 = vector.broadcast %c1_i32_7 : i32 to vector<8x1xi32>
    %23 = arith.cmpi eq, %3, %22 : vector<8x1xi32>
    %24 = vector.broadcast %23 : vector<8x1xi1> to vector<8x512xi1>
    %25 = arith.ori %21, %24 : vector<8x512xi1>
    %c500_i32 = arith.constant 500 : i32
    %26 = arith.subi %c500_i32, %5 : i32
    %27 = vector.broadcast %26 : i32 to vector<8x512xi32>
    %28 = arith.cmpi sge, %6, %27 : vector<8x512xi32>
    %29 = arith.ori %25, %28 : vector<8x512xi1>
    %cst_8 = arith.constant 0.000000e+00 : f32
    %30 = vector.broadcast %cst_8 : f32 to vector<8x512xf32>
    %31 = arith.select %29, %30, %18 : vector<8x512xi1>, vector<8x512xf32>
    %c0_9 = arith.constant 0 : index
    %c0_10 = arith.constant 0 : index
    %32 = vector.load %arg5[%c0_9, %c0_10] : memref<8x512xf32, #tpu.memory_space<vmem>>, vector<8x512xf32>
    %33 = arith.addf %32, %31 : vector<8x512xf32>
    %c0_11 = arith.constant 0 : index
    %c0_12 = arith.constant 0 : index
    %34 = vector.load %arg5[%c0_11, %c0_12] : memref<8x512xf32, #tpu.memory_space<vmem>>, vector<8x512xf32>
    tpu.vector_store %arg5[%c0_11, %c0_12], %33 {strides = array<i32>} : memref<8x512xf32, #tpu.memory_space<vmem>>, vector<8x512xf32>,
    %c0_i32_13 = arith.constant 0 : i32
    %35 = arith.cmpi eq, %arg1, %c0_i32_13 : i32
    %36 = arith.extui %35 : i1 to i32
    %c0_i32_14 = arith.constant 0 : i32
    %37 = arith.cmpi ne, %36, %c0_i32_14 : i32
    scf.if %37 {
      %c0_15 = arith.constant 0 : index
      %c0_16 = arith.constant 0 : index
      %38 = vector.load %arg5[%c0_15, %c0_16] : memref<8x512xf32, #tpu.memory_space<vmem>>, vector<8x512xf32>
      %39 = vector.shape_cast %38 : vector<8x512xf32> to vector<1x8x512xf32>
      %cst_17 = arith.constant dense<0.000000e+00> : vector<1xf32>
      %40 = vector.multi_reduction <add>, %39, %cst_17 [1, 2] : vector<1x8x512xf32> to vector<1xf32>
      %41 = vector.shape_cast %40 : vector<1xf32> to vector<1x1x1xf32>
      %42 = vector.extract %41[0, 0, 0] : f32 from vector<1x1x1xf32>
      %43 = tpu.iota {dimensions = array<i32: 1>} : vector<1x8x128xi32>
      %44 = tpu.iota {dimensions = array<i32: 2>} : vector<1x8x128xi32>
      %c0_i32_18 = arith.constant 0 : i32
      %45 = vector.broadcast %c0_i32_18 : i32 to vector<1x8x128xi32>
      %46 = arith.cmpi eq, %43, %45 : vector<1x8x128xi32>
      %c0_i32_19 = arith.constant 0 : i32
      %47 = vector.broadcast %c0_i32_19 : i32 to vector<1x8x128xi32>
      %48 = arith.cmpi eq, %44, %47 : vector<1x8x128xi32>
      %49 = arith.andi %46, %48 : vector<1x8x128xi1>
      %cst_20 = arith.constant 0.000000e+00 : f32
      %50 = vector.broadcast %42 : f32 to vector<1x8x128xf32>
      %51 = vector.broadcast %cst_20 : f32 to vector<1x8x128xf32>
      %52 = arith.select %49, %50, %51 : vector<1x8x128xi1>, vector<1x8x128xf32>
      %c0_21 = arith.constant 0 : index
      %c0_22 = arith.constant 0 : index
      %c0_23 = arith.constant 0 : index
      %53 = vector.load %arg4[%c0_21, %c0_22, %c0_23] : memref<1x8x128xf32, #tpu.memory_space<vmem>>, vector<1x8x128xf32>
      tpu.vector_store %arg4[%c0_21, %c0_22, %c0_23], %52 {strides = array<i32>} : memref<1x8x128xf32, #tpu.memory_space<vmem>>, vector<1x8x128xf32>,
    } else {
    }
    return
  }
  func.func @transform_0(%arg0: i32, %arg1: i32) -> (i32, i32) {
    %c0_i32 = arith.constant 0 : i32
    %c0_i32_0 = arith.constant 0 : i32
    return %arg0, %c0_i32 : i32, i32
  }
  func.func @transform_1(%arg0: i32, %arg1: i32) -> (i32, i32) {
    %c0_i32 = arith.constant 0 : i32
    return %arg0, %arg1 : i32, i32
  }
  func.func @transform_2(%arg0: i32, %arg1: i32) -> (i32, i32, i32) {
    %c0_i32 = arith.constant 0 : i32
    %c0_i32_0 = arith.constant 0 : i32
    %c0_i32_1 = arith.constant 0 : i32
    return %arg0, %c0_i32, %c0_i32_0 : i32, i32, i32
  }
}

</mosaic_0001>

<bundles_post_ra>
// kernel: tpu_custom_call.1
= control target key start
LH: loop header
LB: loop body
LE: loop exit
PB: predicated region body
PF: predicated region fallthrough
CT: control target
= control target key end

     0   :  { %7 = vsyncpa [#allocation4], 0  ;;  %s261_s0 = inlined_call_operand.vmem [shape: s32[8,1], index: 0, kind: input, shape index: {}]   ;;  %s262_s1 = inlined_call_operand.hbm [shape: f32[8,512], index: 1, kind: input, shape index: {}]   ;;  %s263_s2 = inlined_call_operand.hbm [shape: f32[1,8,128], index: 2, kind: output, shape index: {}]  }
   0x1   :  { %8 = vsyncpa [#allocation5], 0  ;;  %s208_s9 = smov [#allocation3]   ;;  %s160_s13 = scalar_lea.hbm %s262_s1, 512 }
   0x2   :  { %s17_s10 = sshll.u32 %s208_s9, 4  ;;  %p161_p0 = scmp.ne.s32.totalorder %s262_s1, %s160_s13  ;;  %s18_s10 = int_to_ptr.vmem [resolvable:$true] %s17_s10 }
   0x3   :  { %p164_p1 = scmp.lt.u32.totalorder %s160_s13, %s262_s1 }
   0x5   :  { %p166_p2 = pnand %p164_p1, %p161_p0 }
   0x7   :  { %169 = shalt.err (!%p166_p2)
}
   0x8   :  { %s170_s18 = scalar_lea.vmem %s18_s10, 512  ;;  %p175_p4 = scmp.lt.s32.totalorder %s18_s10, %s18_s10 }
   0x9   :  { %p171_p3 = scmp.ne.s32.totalorder %s18_s10, %s170_s18  ;;  %p176_p5 = scmp.lt.s32.totalorder %s170_s18, %s170_s18 }
   0xb   :  { %p177_p6 = por %p176_p5, %p175_p4 }
   0xd   :  { %p178_p7 = pnand %p177_p6, %p171_p3 }
   0xf   :  { %181 = shalt.err (!%p178_p7)
}
  0x10   :  { %20 = dma.hbm_to_vmem [thread:$0]  %s262_s1, 512, %s18_s10, [#allocation4]  }
  0x11   :  { %204 = dma.done.wait [#allocation4], 512  }
  0x12   :  { %205 = vsyncadd [#allocation4], 4294966784  ;;  %v209_v0 = vmov 0   ;;  %v32_v1 = vld [vmem:[%s261_s0] sm:$0xff]  ;;  %v38_v3 = vlaneseq  ;;  %v34_v10 = vld [vmem:[#allocation3 + $0x8] sm:$0xff]  ;;  %s212_s0 = smov [#allocation6]  }
  0x13   :  { %159 = vset.pattern.permute.xlu0 %v209_v0  ;;  %vm74_vm0 = vcmp.eq.s32.totalorder %v32_v1, 1  ;;  %v33_v8 = vld [vmem:[#allocation3] sm:$0xff]  ;;  %v35_v11 = vld [vmem:[#allocation3 + $0x10] sm:$0xff]  ;;  %v36_v12 = vld [vmem:[#allocation3 + $0x18] sm:$0xff]  ;;  %v210_v13 = vmov 0.00020080322  }
  0x14   :  { %46 = vperm.xlu0 %159, %v32_v1   ;;  %v75_v2 = vsel %vm74_vm0, 1, %v209_v0  ;;  %v39_v4 = vand.u32 127, %v38_v3  ;;  %v211_v17 = vmov -0.001709475   ;;  %v130_v46 = vshrl.u32 %v38_v3, 7  ;;  %s143_s1 = sshll.u32 %s212_s0, 4  ;;  %s144_s1 = int_to_ptr.vmem [resolvable:$true] %s143_s1 }
  0x15   :  { %s182_s24 = scalar_lea.vmem %s144_s1, 128  ;;  %p187_p9 = scmp.lt.s32.totalorder %s144_s1, %s144_s1 }
  0x16   :  { %v40_v5 = vadd.s32 128, %v39_v4  ;;  %v41_v6 = vadd.s32 256, %v39_v4  ;;  %v42_v7 = vadd.s32 384, %v39_v4  ;;  %vm70_vm1 = vcmp.eq.s32.totalorder %v39_v4, 1  ;;  %p183_p8 = scmp.ne.s32.totalorder %s144_s1, %s182_s24  ;;  %p188_p10 = scmp.lt.s32.totalorder %s182_s24, %s182_s24 }
  0x17   :  { %vm131_vm10 = vcmp.eq.s32.totalorder %v130_v46, 0  ;;  %vm132_vm11 = vcmp.eq.s32.totalorder %v39_v4, 0 }
  0x18   :  { %77 = vperm.xlu0 %159, %v75_v2   ;;  %vm89_vm6 = vcmp.ge.s32.totalorder %v42_v7, 500  ;;  %vm133_vm12 = vmand %vm131_vm10, %vm132_vm11  ;;  %p189_p11 = por %p188_p10, %p187_p9 }
  0x1a   :  { %p190_p12 = pnand %p189_p11, %p183_p8 }
  0x93   :  { %v47_v9 = vpop.permute.xlu0 %46 }
  0x94   :  { %vm48_vm2 = vcmp.eq.s32.totalorder %v39_v4, %v47_v9  ;;  %vm49_vm3 = vcmp.eq.s32.totalorder %v40_v5, %v47_v9  ;;  %vm50_vm4 = vcmp.eq.s32.totalorder %v41_v6, %v47_v9  ;;  %vm51_vm5 = vcmp.eq.s32.totalorder %v42_v7, %v47_v9 }
  0x95   :  { %v52_v14 = vsel %vm48_vm2, 0.9, %v210_v13  ;;  %v53_v15 = vsel %vm49_vm3, 0.9, %v210_v13  ;;  %v54_v16 = vsel %vm50_vm4, 0.9, %v210_v13 }
  0x96   :  { %v56_v18 = vsel %vm48_vm2, -0.09482446, %v211_v17  ;;  %v60_v19 = vmul.f32 %v52_v14, %v33_v8  ;;  %v61_v20 = vmul.f32 %v53_v15, %v34_v10  ;;  %v57_v21 = vsel %vm49_vm3, -0.09482446, %v211_v17 }
  0x97   :  { %v78_v22 = vpop.permute.xlu0 %77  ;;  %v55_v23 = vsel %vm51_vm5, 0.9, %v210_v13  ;;  %v58_v24 = vsel %vm50_vm4, -0.09482446, %v211_v17  ;;  %v62_v25 = vmul.f32 %v54_v16, %v35_v11  ;;  %v59_v29 = vsel %vm51_vm5, -0.09482446, %v211_v17 }
  0x98   :  { %v64_v26 = vsub.f32 %v56_v18, %v60_v19  ;;  %v65_v27 = vsub.f32 %v57_v21, %v61_v20  ;;  %vm79_vm7 = vcmp.eq.s32.totalorder %v78_v22, 1  ;;  %v63_v28 = vmul.f32 %v55_v23, %v36_v12 }
  0x99   :  { %vm80_vm8 = vmor %vm70_vm1, %vm79_vm7  ;;  %v66_v30 = vsub.f32 %v58_v24, %v62_v25 }
  0x9a   :  { %v94_v31 = vsel %vm80_vm8, 0.0, %v64_v26  ;;  %v95_v32 = vsel %vm79_vm7, 0.0, %v65_v27  ;;  %v67_v33 = vsub.f32 %v59_v29, %v63_v28  ;;  %vm93_vm9 = vmor %vm79_vm7, %vm89_vm6 }
  0x9b   :  { %v117_v34 = vadd.f32 %v95_v32, %v94_v31  ;;  %v96_v35 = vsel %vm79_vm7, 0.0, %v66_v30 }
  0x9c   :  { %v97_v37 = vsel %vm93_vm9, 0.0, %v67_v33 }
  0x9d   :  { %v118_v36 = vadd.f32 %v117_v34, %v96_v35 }
  0x9f   :  { %v119_v38 = vadd.f32 %v118_v36, %v97_v37 }
  0xa1   :  { %120 = vadd.xlane.f32.xlu1 %v119_v38 }
 0x12e   :  { %v121_v39 = vpop.xlane.xlu1 %120 }
 0x12f   :  { %v122_v40 = vrot.slane %v121_v39, 4 }
 0x131   :  { %v123_v41 = vadd.f32 %v122_v40, %v121_v39 }
 0x133   :  { %v124_v42 = vrot.slane %v123_v41, 2 }
 0x135   :  { %v125_v43 = vadd.f32 %v124_v42, %v123_v41 }
 0x137   :  { %v126_v44 = vrot.slane %v125_v43, 1 }
 0x139   :  { %v127_v45 = vadd.f32 %v126_v44, %v125_v43 }
 0x13b   :  { %152 = vpush %v127_v45 }
 0x16c   :  { %s153_s23 = spop %152 }
 0x16d   :  { %v134_v47 = vstv %s153_s23 }
 0x16e   :  { %v135_v48 = vsel %vm133_vm12, %v134_v47, 0.0 }
 0x16f   :  { %136 = vst [vmem:[#allocation6] sm:$0xff] %v135_v48 }
 0x170   :  { %193 = shalt.err (!%p190_p12)
}
 0x171   :  { %s194_s27 = scalar_lea.hbm %s263_s2, 128 }
 0x172   :  { %p195_p13 = scmp.ne.s32.totalorder %s263_s2, %s194_s27  ;;  %p198_p0 = scmp.lt.u32.totalorder %s194_s27, %s263_s2 }
 0x174   :  { %p200_p1 = pnand %p198_p0, %p195_p13 }
 0x176   :  { %203 = shalt.err (!%p200_p1)
}
 0x177   :  { %146 = dma.vmem_to_hbm [thread:$0]  %s144_s1, 128, %s263_s2, [#allocation5]  }
 0x178   :  { %206 = dma.done.wait [#allocation5], 128  }
 0x179   :  { %207 = vsyncadd [#allocation5], 4294967168 }
 0x17a   :  { %150 = vsyncpa [#allocation4], 1 }
 0x17b   :  { %151 = vsyncpa [#allocation5], 1 }

</bundles_post_ra>
